<compile_context>
chip_gen: v6e
topology: v6e:2x2x1
jax: 0.10.0
libtpu: 0.0.40
codegen_flags: <defaults>
</compile_context>

<pallas_src>
import jax
import jax.numpy as jnp
from jax.experimental import pallas as pl
from jax.experimental.pallas import tpu as pltpu

LANE = 128


def _round_up(x, m):
    return ((x + m - 1) // m) * m


def _choose_tiles(n):
    """Pick (TM, TK, N_pad) for the A @ P sweep.

    Small graphs: one tile (grid 1x1).  Large graphs: 512x512 streaming tiles
    (A tile 512KiB bf16, double-buffered ~1MiB) — well inside the 32 MiB
    scoped VMEM on v5e/v6e/v7x with the now-small epilogue operands.
    """
    if n <= 512:
        n_pad = _round_up(n, LANE)
        return n_pad, n_pad, n_pad
    n_pad = _round_up(n, 512)
    return 512, 512, n_pad


# ---------------------------------------------------------------------------
# Pallas kernels
# ---------------------------------------------------------------------------
def _proj_kernel(x_ref, wl_ref, wr_ref, b_ref, p_ref, r_ref):
    """Row-tiled projection of the raw features for layer 0.

    P = X @ Wl   (bf16, streamed into the adjacency sweep)
    R = X @ Wr + b   (f32 root term, added in the sweep epilogue)
    """
    x = x_ref[...]
    p = jnp.dot(x, wl_ref[...], preferred_element_type=jnp.float32)
    p_ref[...] = p.astype(p_ref.dtype)
    r = jnp.dot(x, wr_ref[...], preferred_element_type=jnp.float32)
    r_ref[...] = r + b_ref[...]


def _agg_proj_kernel(a_ref, p_ref, r_ref, idg_ref, wl_ref, wr_ref, b_ref,
                     pn_ref, rn_ref, acc_ref):
    """One SAGEConv layer + ReLU, fused with the NEXT layer's projections.

    acc = sum_k A_tile @ P_kblock            (f32 accumulator over K axis)
    h   = relu(inv_deg * acc + R_rowtile)    (this layer's output, never in HBM)
    P'  = h @ Wl_next ;  R' = h @ Wr_next + b_next
    """
    k = pl.program_id(1)

    @pl.when(k == 0)
    def _():
        acc_ref[...] = jnp.zeros_like(acc_ref)

    acc_ref[...] += jnp.dot(a_ref[...], p_ref[...],
                            preferred_element_type=jnp.float32)

    @pl.when(k == pl.num_programs(1) - 1)
    def _():
        h = jnp.maximum(acc_ref[...] * idg_ref[...] + r_ref[...], 0.0)
        h = h.astype(jnp.bfloat16)
        pn = jnp.dot(h, wl_ref[...], preferred_element_type=jnp.float32)
        pn_ref[...] = pn.astype(pn_ref.dtype)
        rn = jnp.dot(h, wr_ref[...], preferred_element_type=jnp.float32)
        rn_ref[...] = rn + b_ref[...]


def _agg_cls_kernel(a_ref, p_ref, r_ref, idg_ref, wc_ref, bc_ref,
                    o_ref, acc_ref):
    """Last SAGEConv layer + ReLU, fused with the classifier Linear."""
    k = pl.program_id(1)

    @pl.when(k == 0)
    def _():
        acc_ref[...] = jnp.zeros_like(acc_ref)

    acc_ref[...] += jnp.dot(a_ref[...], p_ref[...],
                            preferred_element_type=jnp.float32)

    @pl.when(k == pl.num_programs(1) - 1)
    def _():
        h = jnp.maximum(acc_ref[...] * idg_ref[...] + r_ref[...], 0.0)
        h = h.astype(jnp.bfloat16)
        # TODO(synk): F.dropout(p=0.5, training=self.training) — identity in eval.
        out = jnp.dot(h, wc_ref[...], preferred_element_type=jnp.float32)
        o_ref[...] = out + bc_ref[...]


_AGG_PARAMS = pltpu.CompilerParams(
    dimension_semantics=("parallel", "arbitrary"),   # rows parallel, K reduce
    vmem_limit_bytes=32 * 1024 * 1024,
)
_ROW_PARAMS = pltpu.CompilerParams(
    dimension_semantics=("parallel",),
    vmem_limit_bytes=32 * 1024 * 1024,
)


def project_inputs(x, w_l, w_r, b, *, tm):
    """P = X @ Wl (bf16), R = X @ Wr + b (f32), row-tiled."""
    n_pad, c_in = x.shape
    c_out = w_l.shape[1]
    return pl.pallas_call(
        _proj_kernel,
        out_shape=(jax.ShapeDtypeStruct((n_pad, c_out), jnp.bfloat16),
                   jax.ShapeDtypeStruct((n_pad, c_out), jnp.float32)),
        grid_spec=pltpu.PrefetchScalarGridSpec(
            num_scalar_prefetch=0,
            grid=(n_pad // tm,),
            in_specs=[
                pl.BlockSpec((tm, c_in), lambda i: (i, 0)),       # X row tile
                pl.BlockSpec((c_in, c_out), lambda i: (0, 0)),    # Wl (resident)
                pl.BlockSpec((c_in, c_out), lambda i: (0, 0)),    # Wr (resident)
                pl.BlockSpec((1, c_out), lambda i: (0, 0)),       # bias (resident)
            ],
            out_specs=[
                pl.BlockSpec((tm, c_out), lambda i: (i, 0)),      # P
                pl.BlockSpec((tm, c_out), lambda i: (i, 0)),      # R
            ],
        ),
        compiler_params=_ROW_PARAMS,
    )(x, w_l, w_r, b)


def _agg_in_specs(tm, tk, c):
    return [
        pl.BlockSpec((tm, tk), lambda i, k: (i, k)),      # A tile
        pl.BlockSpec((tk, c), lambda i, k: (k, 0)),       # P k-block (A @ P)
        pl.BlockSpec((tm, c), lambda i, k: (i, 0)),       # R row tile (root term)
        pl.BlockSpec((tm, 1), lambda i, k: (i, 0)),       # 1/deg per row
    ]


def sage_mid_layer(adj, p, r, inv_deg, w_l_next, w_r_next, b_next, *, tm, tk):
    """One SAGE layer; returns (P', R') for the next layer."""
    n_pad = adj.shape[0]
    c = p.shape[1]
    c_next = w_l_next.shape[1]
    grid = (n_pad // tm, n_pad // tk)
    in_specs = _agg_in_specs(tm, tk, c) + [
        pl.BlockSpec((c, c_next), lambda i, k: (0, 0)),   # Wl next (resident)
        pl.BlockSpec((c, c_next), lambda i, k: (0, 0)),   # Wr next (resident)
        pl.BlockSpec((1, c_next), lambda i, k: (0, 0)),   # b next (resident)
    ]
    return pl.pallas_call(
        _agg_proj_kernel,
        out_shape=(jax.ShapeDtypeStruct((n_pad, c_next), jnp.bfloat16),
                   jax.ShapeDtypeStruct((n_pad, c_next), jnp.float32)),
        grid_spec=pltpu.PrefetchScalarGridSpec(
            num_scalar_prefetch=0,
            grid=grid,
            in_specs=in_specs,
            out_specs=[
                pl.BlockSpec((tm, c_next), lambda i, k: (i, 0)),
                pl.BlockSpec((tm, c_next), lambda i, k: (i, 0)),
            ],
            scratch_shapes=[pltpu.VMEM((tm, c), jnp.float32)],
        ),
        compiler_params=_AGG_PARAMS,
    )(adj, p, r, inv_deg, w_l_next, w_r_next, b_next)


def sage_last_layer(adj, p, r, inv_deg, w_c, b_c, *, tm, tk):
    """Last SAGE layer + ReLU + (eval) dropout + classifier, fused."""
    n_pad = adj.shape[0]
    c = p.shape[1]
    n_cls = w_c.shape[1]
    grid = (n_pad // tm, n_pad // tk)
    in_specs = _agg_in_specs(tm, tk, c) + [
        pl.BlockSpec((c, n_cls), lambda i, k: (0, 0)),    # classifier W (resident)
        pl.BlockSpec((1, n_cls), lambda i, k: (0, 0)),    # classifier b (resident)
    ]
    return pl.pallas_call(
        _agg_cls_kernel,
        out_shape=jax.ShapeDtypeStruct((n_pad, n_cls), jnp.float32),
        grid_spec=pltpu.PrefetchScalarGridSpec(
            num_scalar_prefetch=0,
            grid=grid,
            in_specs=in_specs,
            out_specs=pl.BlockSpec((tm, n_cls), lambda i, k: (i, 0)),
            scratch_shapes=[pltpu.VMEM((tm, c), jnp.float32)],
        ),
        compiler_params=_AGG_PARAMS,
    )(adj, p, r, inv_deg, w_c, b_c)


# ---------------------------------------------------------------------------
# Model glue (params, padding, dense adjacency, layer loop)
# ---------------------------------------------------------------------------
def init_sage_params(key, n_layer, input_dim, feat_dim, n_cls):
    """Deterministic parameter init (Kaiming-uniform-ish, like torch Linear)."""
    params = {"layers": []}
    for i in range(n_layer):
        d_in = input_dim if i == 0 else feat_dim
        key, k1, k2, k3 = jax.random.split(key, 4)
        bound = 1.0 / jnp.sqrt(d_in)
        params["layers"].append({
            # stored pre-transposed: [d_in, feat_dim]
            "w_l": jax.random.uniform(k1, (d_in, feat_dim), jnp.float32, -bound, bound),
            "w_r": jax.random.uniform(k2, (d_in, feat_dim), jnp.float32, -bound, bound),
            "b_l": jax.random.uniform(k3, (1, feat_dim), jnp.float32, -bound, bound),
        })
    key, k1, k2 = jax.random.split(key, 3)
    bound = 1.0 / jnp.sqrt(feat_dim)
    params["w_cls"] = jax.random.uniform(k1, (feat_dim, n_cls), jnp.float32, -bound, bound)
    params["b_cls"] = jax.random.uniform(k2, (1, n_cls), jnp.float32, -bound, bound)
    return params


def _pad2(a, rows, cols, dtype):
    out = jnp.zeros((rows, cols), dtype)
    return out.at[:a.shape[0], :a.shape[1]].set(a.astype(dtype))


def pad_params(params):
    """Pad every weight/bias lane dim to a multiple of 128; weights -> bf16."""
    padded = {"layers": []}
    for lyr in params["layers"]:
        d_in, d_out = lyr["w_l"].shape
        d_in_p, d_out_p = _round_up(d_in, LANE), _round_up(d_out, LANE)
        padded["layers"].append({
            "w_l": _pad2(lyr["w_l"], d_in_p, d_out_p, jnp.bfloat16),
            "w_r": _pad2(lyr["w_r"], d_in_p, d_out_p, jnp.bfloat16),
            "b_l": _pad2(lyr["b_l"], 1, d_out_p, jnp.float32),
        })
    d_in, n_cls = params["w_cls"].shape
    padded["w_cls"] = _pad2(params["w_cls"], _round_up(d_in, LANE),
                            _round_up(n_cls, LANE), jnp.bfloat16)
    padded["b_cls"] = _pad2(params["b_cls"], 1, _round_up(n_cls, LANE), jnp.float32)
    return padded


def build_adjacency(edge_index, num_nodes, n_pad):
    """0/1 (count) adjacency in bf16 (exact small integers) + f32 1/deg.

    agg[i] = mean_{j in N_in(i)} x[j]; rows with no in-edges -> 0, matching
    PyG scatter-mean semantics.  1/deg is kept in f32 and applied inside the
    kernel epilogue so the low-precision A stays exact.
    """
    del num_nodes  # padded rows/cols simply stay zero
    src, dst = edge_index[0], edge_index[1]
    adj = jnp.zeros((n_pad, n_pad), jnp.float32)
    adj = adj.at[dst, src].add(1.0)               # A[i, j] = #edges j -> i
    deg = adj.sum(axis=1, keepdims=True)
    inv_deg = jnp.where(deg > 0, 1.0 / jnp.maximum(deg, 1.0), 0.0)
    return adj.astype(jnp.bfloat16), inv_deg.astype(jnp.float32)


def sage_forward(params, x, edge_index, edge_weight=None):
    # edge_weight accepted but unused, matching SAGEConv.message (x_j only).
    del edge_weight
    n, c = x.shape
    n_cls = params["b_cls"].shape[1]
    tm, tk, n_pad = _choose_tiles(n)
    adj, inv_deg = build_adjacency(edge_index, n, n_pad)
    pp = pad_params(params)

    x_p = _pad2(x, n_pad, _round_up(c, LANE), jnp.bfloat16)
    l0 = pp["layers"][0]
    p, r = project_inputs(x_p, l0["w_l"], l0["w_r"], l0["b_l"], tm=tm)

    n_layers = len(pp["layers"])
    out = None
    for i in range(n_layers):
        if i < n_layers - 1:
            nxt = pp["layers"][i + 1]
            p, r = sage_mid_layer(adj, p, r, inv_deg,
                                  nxt["w_l"], nxt["w_r"], nxt["b_l"],
                                  tm=tm, tk=tk)
        else:
            out = sage_last_layer(adj, p, r, inv_deg,
                                  pp["w_cls"], pp["b_cls"], tm=tm, tk=tk)
    return out[:n, :n_cls]


# ---------------------------------------------------------------------------
# Reference (pure JAX, same padding / precision / op order) for a sanity check
# ---------------------------------------------------------------------------
def sage_forward_ref(params, x, edge_index, edge_weight=None):
    del edge_weight
    n, c = x.shape
    n_cls = params["b_cls"].shape[1]
    _, _, n_pad = _choose_tiles(n)
    adj, inv_deg = build_adjacency(edge_index, n, n_pad)
    pp = pad_params(params)

    x_p = _pad2(x, n_pad, _round_up(c, LANE), jnp.bfloat16)
    l0 = pp["layers"][0]
    p = jnp.dot(x_p, l0["w_l"], preferred_element_type=jnp.float32).astype(jnp.bfloat16)
    r = jnp.dot(x_p, l0["w_r"], preferred_element_type=jnp.float32) + l0["b_l"]

    n_layers = len(pp["layers"])
    logits = None
    for i in range(n_layers):
        agg = jnp.dot(adj, p, preferred_element_type=jnp.float32) * inv_deg
        h = jnp.maximum(agg + r, 0.0).astype(jnp.bfloat16)
        if i < n_layers - 1:
            nxt = pp["layers"][i + 1]
            p = jnp.dot(h, nxt["w_l"], preferred_element_type=jnp.float32).astype(jnp.bfloat16)
            r = jnp.dot(h, nxt["w_r"], preferred_element_type=jnp.float32) + nxt["b_l"]
        else:
            logits = jnp.dot(h, pp["w_cls"], preferred_element_type=jnp.float32)
            logits = logits + pp["b_cls"]
    return logits[:n, :n_cls]


if __name__ == "__main__":
    key = jax.random.PRNGKey(0)

    # Small, deterministic problem: 8 nodes, 16 input feats, 32 hidden, 4 classes.
    N, INPUT_DIM, FEAT_DIM, N_CLS, N_LAYER = 8, 16, 32, 4, 2

    key, kx, kp = jax.random.split(key, 3)
    x = jax.random.normal(kx, (N, INPUT_DIM), jnp.float32)

    # deterministic ring + a few extra edges (edge_index = [src; dst])
    src = jnp.array([0, 1, 2, 3, 4, 5, 6, 7, 0, 2, 4, 6], jnp.int32)
    dst = jnp.array([1, 2, 3, 4, 5, 6, 7, 0, 4, 6, 0, 2], jnp.int32)
    edge_index = jnp.stack([src, dst], axis=0)
    edge_weight = jnp.ones((edge_index.shape[1],), jnp.float32)  # unused by SAGEConv

    params = init_sage_params(kp, N_LAYER, INPUT_DIM, FEAT_DIM, N_CLS)

    out = sage_forward(params, x, edge_index, edge_weight)
    out = jax.block_until_ready(out)

    ref = sage_forward_ref(params, x, edge_index, edge_weight)
    assert out.shape == (N, N_CLS), out.shape
    assert jnp.allclose(out, ref, atol=3e-3, rtol=3e-3), "mismatch vs JAX reference"

    print("KERNEL_OK")
</pallas_src>

<mosaic_0001>
module attributes {stable_mosaic.version = 11 : i64} {
  func.func @_proj_kernel(%arg0: i32, %arg1: memref<128x128xbf16, #tpu.memory_space<vmem>>, %arg2: memref<128x128xbf16, #tpu.memory_space<vmem>>, %arg3: memref<128x128xbf16, #tpu.memory_space<vmem>>, %arg4: memref<1x128xf32, #tpu.memory_space<vmem>>, %arg5: memref<128x128xbf16, #tpu.memory_space<vmem>>, %arg6: memref<128x128xf32, #tpu.memory_space<vmem>>) attributes {dimension_semantics = [#tpu.dimension_semantics<parallel>], iteration_bounds = array<i64: 1>, scalar_prefetch = 0 : i64, scratch_operands = 0 : i64, tpu.core_type = #tpu.core_type<tc>, window_params = [{transform_indices = @transform_0, window_bounds = array<i64: 128, 128>}, {pipeline_mode = #tpu.pipeline_mode<synchronous>, transform_indices = @transform_1, window_bounds = array<i64: 128, 128>}, {pipeline_mode = #tpu.pipeline_mode<synchronous>, transform_indices = @transform_2, window_bounds = array<i64: 128, 128>}, {pipeline_mode = #tpu.pipeline_mode<synchronous>, transform_indices = @transform_3, window_bounds = array<i64: 1, 128>}, {transform_indices = @transform_4, window_bounds = array<i64: 128, 128>}, {transform_indices = @transform_5, window_bounds = array<i64: 128, 128>}]} {
    %c0 = arith.constant 0 : index
    %c0_0 = arith.constant 0 : index
    %0 = vector.load %arg1[%c0, %c0_0] : memref<128x128xbf16, #tpu.memory_space<vmem>>, vector<128x128xbf16>
    %c0_1 = arith.constant 0 : index
    %c0_2 = arith.constant 0 : index
    %1 = vector.load %arg2[%c0_1, %c0_2] : memref<128x128xbf16, #tpu.memory_space<vmem>>, vector<128x128xbf16>
    %cst = arith.constant dense<0.000000e+00> : vector<128x128xf32>
    %2 = tpu.matmul %0, %1, %cst {dimension_numbers = #tpu.dot_dimension_numbers<[1], [0], [0], [1], [0, 0, 1, 1], [], []>} : vector<128x128xbf16>, vector<128x128xbf16>, vector<128x128xf32> -> vector<128x128xf32>
    %3 = arith.truncf %2 : vector<128x128xf32> to vector<128x128xbf16>
    %c0_3 = arith.constant 0 : index
    %c0_4 = arith.constant 0 : index
    %4 = vector.load %arg5[%c0_3, %c0_4] : memref<128x128xbf16, #tpu.memory_space<vmem>>, vector<128x128xbf16>
    tpu.vector_store %arg5[%c0_3, %c0_4], %3 {strides = array<i32>} : memref<128x128xbf16, #tpu.memory_space<vmem>>, vector<128x128xbf16>,
    %c0_5 = arith.constant 0 : index
    %c0_6 = arith.constant 0 : index
    %5 = vector.load %arg3[%c0_5, %c0_6] : memref<128x128xbf16, #tpu.memory_space<vmem>>, vector<128x128xbf16>
    %cst_7 = arith.constant dense<0.000000e+00> : vector<128x128xf32>
    %6 = tpu.matmul %0, %5, %cst_7 {dimension_numbers = #tpu.dot_dimension_numbers<[1], [0], [0], [1], [0, 0, 1, 1], [], []>} : vector<128x128xbf16>, vector<128x128xbf16>, vector<128x128xf32> -> vector<128x128xf32>
    %c0_8 = arith.constant 0 : index
    %c0_9 = arith.constant 0 : index
    %7 = vector.load %arg4[%c0_8, %c0_9] : memref<1x128xf32, #tpu.memory_space<vmem>>, vector<1x128xf32>
    %8 = vector.broadcast %7 : vector<1x128xf32> to vector<128x128xf32>
    %9 = arith.addf %6, %8 : vector<128x128xf32>
    %c0_10 = arith.constant 0 : index
    %c0_11 = arith.constant 0 : index
    %10 = vector.load %arg6[%c0_10, %c0_11] : memref<128x128xf32, #tpu.memory_space<vmem>>, vector<128x128xf32>
    tpu.vector_store %arg6[%c0_10, %c0_11], %9 {strides = array<i32>} : memref<128x128xf32, #tpu.memory_space<vmem>>, vector<128x128xf32>,
    return
  }
  func.func @transform_0(%arg0: i32) -> (i32, i32) {
    %c0_i32 = arith.constant 0 : i32
    %c0_i32_0 = arith.constant 0 : i32
    return %arg0, %c0_i32 : i32, i32
  }
  func.func @transform_1(%arg0: i32) -> (i32, i32) {
    %c0_i32 = arith.constant 0 : i32
    %c0_i32_0 = arith.constant 0 : i32
    %c0_i32_1 = arith.constant 0 : i32
    return %c0_i32, %c0_i32_0 : i32, i32
  }
  func.func @transform_2(%arg0: i32) -> (i32, i32) {
    %c0_i32 = arith.constant 0 : i32
    %c0_i32_0 = arith.constant 0 : i32
    %c0_i32_1 = arith.constant 0 : i32
    return %c0_i32, %c0_i32_0 : i32, i32
  }
  func.func @transform_3(%arg0: i32) -> (i32, i32) {
    %c0_i32 = arith.constant 0 : i32
    %c0_i32_0 = arith.constant 0 : i32
    %c0_i32_1 = arith.constant 0 : i32
    return %c0_i32, %c0_i32_0 : i32, i32
  }
  func.func @transform_4(%arg0: i32) -> (i32, i32) {
    %c0_i32 = arith.constant 0 : i32
    %c0_i32_0 = arith.constant 0 : i32
    return %arg0, %c0_i32 : i32, i32
  }
  func.func @transform_5(%arg0: i32) -> (i32, i32) {
    %c0_i32 = arith.constant 0 : i32
    %c0_i32_0 = arith.constant 0 : i32
    return %arg0, %c0_i32 : i32, i32
  }
}

</mosaic_0001>

<bundles_post_ra>
// kernel: tpu_custom_call.1
= control target key start
LH: loop header
LB: loop body
LE: loop exit
PB: predicated region body
PF: predicated region fallthrough
CT: control target
= control target key end

     0   :  { %11 = vsyncpa [#allocation3], 0  ;;  %s1014_s0 = inlined_call_operand.hbm [shape: bf16[128,128], index: 0, kind: input, shape index: {}]   ;;  %s1015_s1 = inlined_call_operand.hbm [shape: bf16[128,128], index: 1, kind: input, shape index: {}]   ;;  %s1016_s2 = inlined_call_operand.hbm [shape: bf16[128,128], index: 2, kind: input, shape index: {}]   ;;  %s1017_s3 = inlined_call_operand.vmem [shape: f32[1,128], index: 3, kind: input, shape index: {}]   ;;  %s1018_s4 = inlined_call_operand.hbm [shape: bf16[128,128], index: 4, kind: output, shape index: {0}]   ;;  %s1019_s5 = inlined_call_operand.hbm [shape: f32[128,128], index: 5, kind: output, shape index: {1}]  }
   0x1   :  { %12 = vsyncpa [#allocation6], 0 }
   0x2   :  { %13 = vsyncpa [#allocation4], 0 }
   0x3   :  { %14 = vsyncpa [#allocation10], 0  ;;  %s927_s18 = smov [#allocation5]   ;;  %s928_s20 = smov [#allocation2]  }
   0x4   :  { %s32_s19 = sshll.u32 %s927_s18, 4  ;;  %s20_s21 = sshll.u32 %s928_s20, 4  ;;  %s33_s19 = int_to_ptr.vmem [resolvable:$true] %s32_s19  ;;  %s21_s21 = int_to_ptr.vmem [resolvable:$true] %s20_s21 }
   0x5   :  { %s827_s22 = scalar_lea.vmem %s33_s19, 1024  ;;  %p832_p1 = scmp.lt.s32.totalorder %s33_s19, %s33_s19 }
   0x6   :  { %p828_p0 = scmp.ne.s32.totalorder %s33_s19, %s827_s22  ;;  %p833_p2 = scmp.lt.s32.totalorder %s827_s22, %s827_s22 }
   0x8   :  { %p834_p3 = por %p833_p2, %p832_p1 }
   0xa   :  { %p835_p4 = pnand %p834_p3, %p828_p0 }
   0xc   :  { %838 = shalt.err (!%p835_p4)
}
   0xd   :  { %s929_s23 = smov 64   ;;  %s930_s24 = smov 4  }
   0xe   :  { %38 = dma.hbm_to_vmem [thread:$0]  %s1015_s1, 1024, %s33_s19, [#allocation6], %s929_s23, %s929_s23, %s930_s24  }
   0xf   :  { %s847_s27 = scalar_lea.vmem %s21_s21, 1024  ;;  %p852_p6 = scmp.lt.s32.totalorder %s21_s21, %s21_s21 }
  0x10   :  { %p848_p5 = scmp.ne.s32.totalorder %s21_s21, %s847_s27  ;;  %p853_p7 = scmp.lt.s32.totalorder %s847_s27, %s847_s27 }
  0x12   :  { %p854_p8 = por %p853_p7, %p852_p6 }
  0x14   :  { %p855_p9 = pnand %p854_p8, %p848_p5 }
  0x16   :  { %858 = shalt.err (!%p855_p9)
}
  0x17   :  { %26 = dma.hbm_to_vmem [thread:$0]  %s1014_s0, 1024, %s21_s21, [#allocation3], %s929_s23, %s929_s23, %s930_s24  }
  0x18   :  { %s931_s30 = smov [#allocation7]  }
  0x19   :  { %s44_s6 = sshll.u32 %s931_s30, 4  ;;  %s45_s6 = int_to_ptr.vmem [resolvable:$true] %s44_s6 }
  0x1a   :  { %s867_s7 = scalar_lea.vmem %s45_s6, 1024  ;;  %p872_p11 = scmp.lt.s32.totalorder %s45_s6, %s45_s6 }
  0x1b   :  { %p868_p10 = scmp.ne.s32.totalorder %s45_s6, %s867_s7  ;;  %p873_p12 = scmp.lt.s32.totalorder %s867_s7, %s867_s7 }
  0x1d   :  { %p874_p13 = por %p873_p12, %p872_p11 }
  0x1f   :  { %p875_p0 = pnand %p874_p13, %p868_p10 }
  0x21   :  { %878 = shalt.err (!%p875_p0)
}
  0x22   :  { %50 = dma.hbm_to_vmem [thread:$0]  %s1016_s2, 1024, %s45_s6, [#allocation6], %s929_s23, %s929_s23, %s930_s24  }
  0x23   :  { %919 = dma.done.wait [#allocation3], 1024  }
  0x24   :  { %920 = vsyncadd [#allocation3], 4294966272 }
  0x25   :  { %921 = dma.done.wait [#allocation6], 2048  }
  0x26   :  { %922 = vsyncadd [#allocation6], 4294965248  ;;  %v795_v0 = vld [vmem:[#allocation5 + $0x38] sm:$0xff]   ;;  %v797_v2 = vld [vmem:[#allocation5 + $0x30] sm:$0xff]   ;;  %s933_s10 = smov [#allocation9]  }
  0x27   :  { %v796_v1 = vld [vmem:[#allocation7 + $0x38] sm:$0xff]   ;;  %722 = vmatprep.subr.bf16.mxu0 %v795_v0  ;;  %v798_v3 = vld [vmem:[#allocation7 + $0x30] sm:$0xff]   ;;  %v799_v4 = vld [vmem:[#allocation5 + $0x28] sm:$0xff]   ;;  %s569_s11 = sshll.u32 %s933_s10, 4  ;;  %s570_s11 = int_to_ptr.vmem [resolvable:$true] %s569_s11 }
  0x28   :  { %754 = vmatprep.subr.bf16.mxu1 %v796_v1  ;;  %723 = vmatpush3.bf16.msra.mxu0 %v795_v0  ;;  %v800_v5 = vld [vmem:[#allocation7 + $0x28] sm:$0xff]   ;;  %v801_v6 = vld [vmem:[#allocation5 + $0x20] sm:$0xff]   ;;  %v803_v8 = vld [vmem:[#allocation5 + $0x18] sm:$0xff]  }
  0x29   :  { %755 = vmatpush3.bf16.msra.mxu1 %v796_v1  ;;  %724 = vmatprep.subr.bf16.mxu0 %v797_v2  ;;  %v802_v7 = vld [vmem:[#allocation7 + $0x20] sm:$0xff]   ;;  %v804_v9 = vld [vmem:[#allocation7 + $0x18] sm:$0xff]   ;;  %v805_v10 = vld [vmem:[#allocation5 + $0x10] sm:$0xff]  }
  0x2a   :  { %756 = vmatprep.subr.bf16.mxu1 %v798_v3  ;;  %v811_v11 = vld [vmem:[#allocation2] sm:$0xff]   ;;  %v806_v12 = vld [vmem:[#allocation7 + $0x10] sm:$0xff]   ;;  %v807_v13 = vld [vmem:[#allocation5 + $0x8] sm:$0xff]  }
  0x2b   :  { %738 = vmatprep.mubr.bf16.mxu0 %v811_v11  ;;  %770 = vmatprep.mubr.bf16.mxu1 %v811_v11  ;;  %v808_v14 = vld [vmem:[#allocation7 + $0x8] sm:$0xff]   ;;  %v809_v15 = vld [vmem:[#allocation5] sm:$0xff]   ;;  %v813_v18 = vld [vmem:[#allocation2 + $0x10] sm:$0xff]  }
  0x2c   :  { %725 = vmatpush3.bf16.msra.mxu0 %v797_v2  ;;  %v810_v16 = vld [vmem:[#allocation7] sm:$0xff]   ;;  %v812_v17 = vld [vmem:[#allocation2 + $0x8] sm:$0xff]   ;;  %v814_v19 = vld [vmem:[#allocation2 + $0x18] sm:$0xff]  }
  0x2d   :  { %757 = vmatpush3.bf16.msra.mxu1 %v798_v3  ;;  %726 = vmatprep.subr.bf16.mxu0 %v799_v4  ;;  %v815_v20 = vld [vmem:[#allocation2 + $0x20] sm:$0xff]   ;;  %v816_v21 = vld [vmem:[#allocation2 + $0x28] sm:$0xff]   ;;  %v817_v22 = vld [vmem:[#allocation2 + $0x30] sm:$0xff]  }
  0x2e   :  { %758 = vmatprep.subr.bf16.mxu1 %v800_v5  ;;  %v818_v23 = vld [vmem:[#allocation2 + $0x38] sm:$0xff]   ;;  %v987_v24 = vld [vmem:[%s1017_s3] ss:$0 sm:$0xff]  ;;  %s932_s3 = smov [#allocation8]  }
  0x2f   :  { %s557_s9 = sshll.u32 %s932_s3, 4  ;;  %s558_s9 = int_to_ptr.vmem [resolvable:$true] %s557_s9 }
  0x30   :  { %727 = vmatpush3.bf16.msra.mxu0 %v799_v4  ;;  %s879_s12 = scalar_lea.vmem %s558_s9, 1024  ;;  %p884_p2 = scmp.lt.s32.totalorder %s558_s9, %s558_s9 }
  0x31   :  { %759 = vmatpush3.bf16.msra.mxu1 %v800_v5  ;;  %728 = vmatprep.subr.bf16.mxu0 %v801_v6  ;;  %p880_p1 = scmp.ne.s32.totalorder %s558_s9, %s879_s12  ;;  %p885_p3 = scmp.lt.s32.totalorder %s879_s12, %s879_s12 }
  0x32   :  { %760 = vmatprep.subr.bf16.mxu1 %v802_v7 }
  0x33   :  { %p886_p4 = por %p885_p3, %p884_p2 }
  0x34   :  { %729 = vmatpush3.bf16.msra.mxu0 %v801_v6 }
  0x35   :  { %761 = vmatpush3.bf16.msra.mxu1 %v802_v7  ;;  %730 = vmatprep.subr.bf16.mxu0 %v803_v8  ;;  %p887_p5 = pnand %p886_p4, %p880_p1 }
  0x36   :  { %762 = vmatprep.subr.bf16.mxu1 %v804_v9 }
  0x38   :  { %731 = vmatpush3.bf16.msra.mxu0 %v803_v8 }
  0x39   :  { %763 = vmatpush3.bf16.msra.mxu1 %v804_v9  ;;  %732 = vmatprep.subr.bf16.mxu0 %v805_v10 }
  0x3a   :  { %764 = vmatprep.subr.bf16.mxu1 %v806_v12 }
  0x3c   :  { %733 = vmatpush3.bf16.msra.mxu0 %v805_v10 }
  0x3d   :  { %765 = vmatpush3.bf16.msra.mxu1 %v806_v12  ;;  %734 = vmatprep.subr.bf16.mxu0 %v807_v13 }
  0x3e   :  { %766 = vmatprep.subr.bf16.mxu1 %v808_v14 }
  0x40   :  { %735 = vmatpush3.bf16.msra.mxu0 %v807_v13 }
  0x41   :  { %767 = vmatpush3.bf16.msra.mxu1 %v808_v14  ;;  %736 = vmatprep.subr.bf16.mxu0 %v809_v15 }
  0x42   :  { %768 = vmatprep.subr.bf16.mxu1 %v810_v16 }
  0x44   :  { %737 = vmatpush3.bf16.msra.mxu0 %v809_v15 }
  0x45   :  { %769 = vmatpush3.bf16.msra.mxu1 %v810_v16 }
  0x47   :  { %739 = vmatmul.mubr.bf16.vlgmr.msra.gmra.mxu0 %v812_v17 }
  0x48   :  { %771 = vmatmul.mubr.bf16.vlgmr.msra.gmra.mxu1 %v812_v17  ;;  %742 = vmatprep.mubr.bf16.mxu0 %v813_v18 }
  0x49   :  { %774 = vmatprep.mubr.bf16.mxu1 %v813_v18 }
  0x4f   :  { %743 = vmatmul.mubr.bf16.gmra.mxu0 %v814_v19 }
  0x50   :  { %775 = vmatmul.mubr.bf16.gmra.mxu1 %v814_v19  ;;  %746 = vmatprep.mubr.bf16.mxu0 %v815_v20 }
  0x51   :  { %778 = vmatprep.mubr.bf16.mxu1 %v815_v20 }
  0x57   :  { %747 = vmatmul.mubr.bf16.gmra.mxu0 %v816_v21 }
  0x58   :  { %779 = vmatmul.mubr.bf16.gmra.mxu1 %v816_v21  ;;  %750 = vmatprep.mubr.bf16.mxu0 %v817_v22 }
  0x59   :  { %782 = vmatprep.mubr.bf16.mxu1 %v817_v22 }
  0x5f   :  { %751 = vmatmul.mubr.bf16.gmra.mxu0 %v818_v23 }
  0x60   :  { %783 = vmatmul.mubr.bf16.gmra.mxu1 %v818_v23 }
 0x107   :  { %v740_v25 = vpop.f32.mrf.mxu0 }
 0x108   :  { %v772_v26 = vpop.f32.mrf.mxu1 }
 0x109   :  { %v482_v27 = vadd.f32 %v772_v26, %v987_v24  ;;  %v225_v28 = vpop.f32.mrf.mxu0 }
 0x10a   :  { %v473_v29 = vpop.f32.mrf.mxu1 }
 0x10b   :  { %538 = vst [vmem:[#allocation9 + $0x10] sm:$0xff] %v482_v27  ;;  %v474_v30 = vadd.f32 %v987_v24, %v473_v29  ;;  %v741_v31 = vpop.f32.mrf.mxu0 }
 0x10c   :  { %v651_v32 = vpack.c.bf16 %v741_v31, %v740_v25  ;;  %v773_v33 = vpop.f32.mrf.mxu1 }
 0x10d   :  { %536 = vst [vmem:[#allocation9] sm:$0xff] %v474_v30  ;;  %v485_v34 = vadd.f32 %v773_v33, %v987_v24  ;;  %v228_v35 = vpop.f32.mrf.mxu0 }
 0x10e   :  { %683 = vst [vmem:[#allocation8 + $0x8] sm:$0xff] %v651_v32   ;;  %v646_v36 = vpack.c.bf16 %v228_v35, %v225_v28  ;;  %v476_v37 = vpop.f32.mrf.mxu1 }
 0x10f   :  { %539 = vst [vmem:[#allocation9 + $0x18] sm:$0xff] %v485_v34  ;;  %v477_v38 = vadd.f32 %v987_v24, %v476_v37  ;;  %v744_v39 = vpop.f32.mrf.mxu0 }
 0x110   :  { %647 = vst [vmem:[#allocation8] sm:$0xff] %v646_v36   ;;  %v776_v40 = vpop.f32.mrf.mxu1 }
 0x111   :  { %537 = vst [vmem:[#allocation9 + $0x8] sm:$0xff] %v477_v38  ;;  %v498_v41 = vadd.f32 %v776_v40, %v987_v24  ;;  %v241_v42 = vpop.f32.mrf.mxu0 }
 0x112   :  { %v489_v43 = vpop.f32.mrf.mxu1 }
 0x113   :  { %542 = vst [vmem:[#allocation9 + $0x30] sm:$0xff] %v498_v41  ;;  %v490_v44 = vadd.f32 %v987_v24, %v489_v43  ;;  %v745_v45 = vpop.f32.mrf.mxu0 }
 0x114   :  { %v661_v46 = vpack.c.bf16 %v745_v45, %v744_v39  ;;  %v777_v47 = vpop.f32.mrf.mxu1 }
 0x115   :  { %540 = vst [vmem:[#allocation9 + $0x20] sm:$0xff] %v490_v44  ;;  %v501_v48 = vadd.f32 %v777_v47, %v987_v24  ;;  %v244_v49 = vpop.f32.mrf.mxu0 }
 0x116   :  { %685 = vst [vmem:[#allocation8 + $0x18] sm:$0xff] %v661_v46   ;;  %v656_v50 = vpack.c.bf16 %v244_v49, %v241_v42  ;;  %v492_v51 = vpop.f32.mrf.mxu1 }
 0x117   :  { %543 = vst [vmem:[#allocation9 + $0x38] sm:$0xff] %v501_v48  ;;  %v493_v52 = vadd.f32 %v987_v24, %v492_v51  ;;  %v748_v53 = vpop.f32.mrf.mxu0 }
 0x118   :  { %684 = vst [vmem:[#allocation8 + $0x10] sm:$0xff] %v656_v50   ;;  %v780_v54 = vpop.f32.mrf.mxu1 }
 0x119   :  { %541 = vst [vmem:[#allocation9 + $0x28] sm:$0xff] %v493_v52  ;;  %v514_v55 = vadd.f32 %v780_v54, %v987_v24  ;;  %v257_v56 = vpop.f32.mrf.mxu0 }
 0x11a   :  { %v505_v57 = vpop.f32.mrf.mxu1 }
 0x11b   :  { %546 = vst [vmem:[#allocation9 + $0x50] sm:$0xff] %v514_v55  ;;  %v506_v58 = vadd.f32 %v987_v24, %v505_v57  ;;  %v749_v59 = vpop.f32.mrf.mxu0 }
 0x11c   :  { %v671_v60 = vpack.c.bf16 %v749_v59, %v748_v53  ;;  %v781_v61 = vpop.f32.mrf.mxu1 }
 0x11d   :  { %544 = vst [vmem:[#allocation9 + $0x40] sm:$0xff] %v506_v58  ;;  %v517_v62 = vadd.f32 %v781_v61, %v987_v24  ;;  %v260_v63 = vpop.f32.mrf.mxu0 }
 0x11e   :  { %687 = vst [vmem:[#allocation8 + $0x28] sm:$0xff] %v671_v60   ;;  %v666_v0 = vpack.c.bf16 %v260_v63, %v257_v56  ;;  %v508_v1 = vpop.f32.mrf.mxu1 }
 0x11f   :  { %547 = vst [vmem:[#allocation9 + $0x58] sm:$0xff] %v517_v62  ;;  %v509_v2 = vadd.f32 %v987_v24, %v508_v1  ;;  %v752_v3 = vpop.f32.mrf.mxu0 }
 0x120   :  { %686 = vst [vmem:[#allocation8 + $0x20] sm:$0xff] %v666_v0   ;;  %v784_v4 = vpop.f32.mrf.mxu1 }
 0x121   :  { %545 = vst [vmem:[#allocation9 + $0x48] sm:$0xff] %v509_v2  ;;  %v530_v5 = vadd.f32 %v784_v4, %v987_v24  ;;  %v273_v6 = vpop.f32.mrf.mxu0 }
 0x122   :  { %v521_v7 = vpop.f32.mrf.mxu1 }
 0x123   :  { %550 = vst [vmem:[#allocation9 + $0x70] sm:$0xff] %v530_v5  ;;  %v522_v8 = vadd.f32 %v987_v24, %v521_v7  ;;  %v753_v9 = vpop.f32.mrf.mxu0 }
 0x124   :  { %v681_v10 = vpack.c.bf16 %v753_v9, %v752_v3  ;;  %v785_v11 = vpop.f32.mrf.mxu1 }
 0x125   :  { %548 = vst [vmem:[#allocation9 + $0x60] sm:$0xff] %v522_v8  ;;  %v533_v12 = vadd.f32 %v785_v11, %v987_v24  ;;  %v276_v13 = vpop.f32.mrf.mxu0 }
 0x126   :  { %689 = vst [vmem:[#allocation8 + $0x38] sm:$0xff] %v681_v10   ;;  %v676_v14 = vpack.c.bf16 %v276_v13, %v273_v6  ;;  %v524_v15 = vpop.f32.mrf.mxu1 }
 0x127   :  { %551 = vst [vmem:[#allocation9 + $0x78] sm:$0xff] %v533_v12  ;;  %v525_v16 = vadd.f32 %v987_v24, %v524_v15 }
 0x128   :  { %688 = vst [vmem:[#allocation8 + $0x30] sm:$0xff] %v676_v14  }
 0x129   :  { %549 = vst [vmem:[#allocation9 + $0x68] sm:$0xff] %v525_v16 }
 0x12a   :  { %890 = shalt.err (!%p887_p5)
}
 0x12b   :  { %563 = dma.vmem_to_hbm [thread:$0]  %s558_s9, 1024, %s1018_s4, [#allocation4], %s929_s23, %s929_s23, %s930_s24  }
 0x12c   :  { %s899_s15 = scalar_lea.vmem %s570_s11, 2048  ;;  %p904_p7 = scmp.lt.s32.totalorder %s570_s11, %s570_s11 }
 0x12d   :  { %p900_p6 = scmp.ne.s32.totalorder %s570_s11, %s899_s15  ;;  %p905_p8 = scmp.lt.s32.totalorder %s899_s15, %s899_s15 }
 0x12f   :  { %p906_p9 = por %p905_p8, %p904_p7 }
 0x131   :  { %p907_p10 = pnand %p906_p9, %p900_p6 }
 0x133   :  { %910 = shalt.err (!%p907_p10)
}
 0x134   :  { %s934_s16 = smov 128   ;;  %s935_s17 = smov 8  }
 0x135   :  { %575 = dma.vmem_to_hbm [thread:$0]  %s570_s11, 2048, %s1019_s5, [#allocation10], %s934_s16, %s934_s16, %s935_s17  }
 0x136   :  { %923 = dma.done.wait [#allocation4], 1024  }
 0x137   :  { %924 = vsyncadd [#allocation4], 4294966272 }
 0x138   :  { %925 = dma.done.wait [#allocation10], 2048  }
 0x139   :  { %926 = vsyncadd [#allocation10], 4294965248 }
 0x13a   :  { %582 = vsyncpa [#allocation3], 1 }
 0x13b   :  { %583 = vsyncpa [#allocation6], 1 }
 0x13c   :  { %584 = vsyncpa [#allocation4], 1 }
 0x13d   :  { %585 = vsyncpa [#allocation10], 1 }

</bundles_post_ra>
